<compile_context>
chip_gen: v7x
topology: tpu7x:2x2x1
jax: 0.10.0
libtpu: 0.0.40
codegen_flags: <defaults>
</compile_context>

<pallas_src>
import functools

import jax
import jax.numpy as jnp
from jax.experimental import pallas as pl
from jax.experimental.pallas import tpu as pltpu


OUT_PAD = 128  # lane-dense padded output width (food|price|area|request|zeros)


def predictor_kernel(x_ref, w_ref, b_ref, out_ref, *, req_start, req_stop):
    """x_ref: [B, 4H] f32, w_ref: [4H, OUT_PAD] bf16 (block-diagonal),
    b_ref: [1, OUT_PAD] f32, out_ref: [B, OUT_PAD] f32."""
    # Single MXU pass: bf16 operands, f32 accumulation.
    x = x_ref[...].astype(jnp.bfloat16)
    logits = (
        jnp.dot(x, w_ref[...], preferred_element_type=jnp.float32) + b_ref[...]
    )
    # Sigmoid only on the request-head lanes (VPU select; EUP does the exp).
    lane = jax.lax.broadcasted_iota(jnp.int32, logits.shape, dimension=1)
    is_req = (lane >= req_start) & (lane < req_stop)
    out_ref[...] = jnp.where(is_req, jax.nn.sigmoid(logits), logits).astype(
        out_ref.dtype
    )


def pack_heads(params, hidden_size):
    """Pack 4 Linear heads into a block-diagonal [4H, OUT_PAD] bf16 weight and a
    concatenated [1, OUT_PAD] f32 bias.  Weights are stored [H, C] (transposed
    vs torch) so the packed matmul is  gates_flat @ W_packed + b_packed."""
    heads = ("food", "price_range", "area", "request")
    sizes = [int(params[h][0].shape[1]) for h in heads]
    total = sum(sizes)
    assert total <= OUT_PAD

    w_packed = jnp.zeros((4 * hidden_size, OUT_PAD), jnp.float32)
    b_packed = jnp.zeros((1, OUT_PAD), jnp.float32)
    col = 0
    for k, h in enumerate(heads):
        w_k, b_k = params[h]
        c = sizes[k]
        w_packed = w_packed.at[
            k * hidden_size : (k + 1) * hidden_size, col : col + c
        ].set(w_k)
        b_packed = b_packed.at[:, col : col + c].set(b_k)
        col += c
    return w_packed.astype(jnp.bfloat16), b_packed, sizes


def predictor_forward(gates, params):
    """gates: [B, 4, H] float32.  params: dict of (W[H,C], b[1,C]) per head.
    Returns (food, price_range, area, request) with request sigmoid-activated."""
    B, S, H = gates.shape
    assert S == 4, "Predictor expects gates[:, 0..3, :]"

    w_packed, b_packed, sizes = pack_heads(params, H)
    cf, cp, ca, cr = sizes
    req_start = cf + cp + ca
    req_stop = req_start + cr

    # Lane-dense input: one [B, 4H] slab (H=32 -> 128 lanes fully used).
    x = gates.reshape(B, 4 * H)

    vmem = pl.BlockSpec(memory_space=pltpu.MemorySpace.VMEM)
    out = pl.pallas_call(
        functools.partial(
            predictor_kernel, req_start=req_start, req_stop=req_stop
        ),
        out_shape=jax.ShapeDtypeStruct((B, OUT_PAD), jnp.float32),
        in_specs=[vmem, vmem, vmem],
        out_specs=vmem,
    )(x, w_packed, b_packed)

    # Static slices in the wrapper recover the four heads.
    food = out[:, 0:cf]
    price = out[:, cf : cf + cp]
    area = out[:, cf + cp : cf + cp + ca]
    request = out[:, req_start:req_stop]
    return food, price, area, request


def init_linear(key, in_features, out_features):
    """Deterministic init mimicking torch.nn.Linear (uniform +-1/sqrt(fan_in)).
    Weight stored as [in_features, out_features] (transposed vs torch)."""
    kw, kb = jax.random.split(key)
    bound = 1.0 / jnp.sqrt(jnp.float32(in_features))
    w = jax.random.uniform(
        kw, (in_features, out_features), jnp.float32, -bound, bound
    )
    b = jax.random.uniform(kb, (1, out_features), jnp.float32, -bound, bound)
    return w, b


if __name__ == "__main__":
    # Small shapes consistent with the module's forward.
    B = 2        # batch
    H = 32       # params.hidden_size  (4*H = 128 -> one full MXU contraction)
    FOOD_C = 8   # params.food_class
    PRICE_C = 4  # params.price_range_class
    AREA_C = 6   # params.area_class
    REQ_C = 8    # params.request_class

    root = jax.random.PRNGKey(0)
    k_in, k_f, k_p, k_a, k_r = jax.random.split(root, 5)

    gates = jax.random.normal(k_in, (B, 4, H), dtype=jnp.float32)

    params = {
        "food": init_linear(k_f, H, FOOD_C),
        "price_range": init_linear(k_p, H, PRICE_C),
        "area": init_linear(k_a, H, AREA_C),
        "request": init_linear(k_r, H, REQ_C),
    }

    fwd = jax.jit(lambda g: predictor_forward(g, params))
    food_pred, price_pred, area_pred, req_pred = fwd(gates)
    jax.block_until_ready((food_pred, price_pred, area_pred, req_pred))

    # Reference in plain f32 JAX (eval-mode dropout == identity).  The kernel
    # uses bf16 MXU operands with f32 accumulation, so compare with a relaxed
    # tolerance (~bf16 precision over a 32-long contraction).
    def ref(g):
        f = g[:, 0, :] @ params["food"][0] + params["food"][1]
        p = g[:, 1, :] @ params["price_range"][0] + params["price_range"][1]
        a = g[:, 2, :] @ params["area"][0] + params["area"][1]
        r = jax.nn.sigmoid(
            g[:, 3, :] @ params["request"][0] + params["request"][1]
        )
        return f, p, a, r

    rf, rp, ra, rr = ref(gates)
    assert jnp.allclose(food_pred, rf, atol=5e-2, rtol=5e-2)
    assert jnp.allclose(price_pred, rp, atol=5e-2, rtol=5e-2)
    assert jnp.allclose(area_pred, ra, atol=5e-2, rtol=5e-2)
    assert jnp.allclose(req_pred, rr, atol=5e-2, rtol=5e-2)
    assert food_pred.shape == (B, FOOD_C)
    assert price_pred.shape == (B, PRICE_C)
    assert area_pred.shape == (B, AREA_C)
    assert req_pred.shape == (B, REQ_C)

    print("KERNEL_OK")
</pallas_src>

<mosaic_0001>
module attributes {stable_mosaic.version = 11 : i64} {
  func.func @predictor_kernel(%arg0: memref<2x128xf32, #tpu.memory_space<vmem>>, %arg1: memref<128x128xbf16, #tpu.memory_space<vmem>>, %arg2: memref<1x128xf32, #tpu.memory_space<vmem>>, %arg3: memref<2x128xf32, #tpu.memory_space<vmem>>) attributes {dimension_semantics = [], scalar_prefetch = 0 : i64, scratch_operands = 0 : i64, tpu.core_type = #tpu.core_type<tc>} {
    %c0 = arith.constant 0 : index
    %c0_0 = arith.constant 0 : index
    %0 = vector.load %arg0[%c0, %c0_0] : memref<2x128xf32, #tpu.memory_space<vmem>>, vector<2x128xf32>
    %1 = arith.truncf %0 : vector<2x128xf32> to vector<2x128xbf16>
    %c0_1 = arith.constant 0 : index
    %c0_2 = arith.constant 0 : index
    %2 = vector.load %arg1[%c0_1, %c0_2] : memref<128x128xbf16, #tpu.memory_space<vmem>>, vector<128x128xbf16>
    %cst = arith.constant dense<0.000000e+00> : vector<2x128xf32>
    %3 = tpu.matmul %1, %2, %cst {dimension_numbers = #tpu.dot_dimension_numbers<[1], [0], [0], [1], [0, 0, 1, 1], [], []>} : vector<2x128xbf16>, vector<128x128xbf16>, vector<2x128xf32> -> vector<2x128xf32>
    %c0_3 = arith.constant 0 : index
    %c0_4 = arith.constant 0 : index
    %4 = vector.load %arg2[%c0_3, %c0_4] : memref<1x128xf32, #tpu.memory_space<vmem>>, vector<1x128xf32>
    %5 = vector.broadcast %4 : vector<1x128xf32> to vector<2x128xf32>
    %6 = arith.addf %3, %5 : vector<2x128xf32>
    %7 = tpu.iota {dimensions = array<i32: 1>} : vector<2x128xi32>
    %c18_i32 = arith.constant 18 : i32
    %8 = vector.broadcast %c18_i32 : i32 to vector<2x128xi32>
    %9 = arith.cmpi sge, %7, %8 : vector<2x128xi32>
    %c26_i32 = arith.constant 26 : i32
    %10 = vector.broadcast %c26_i32 : i32 to vector<2x128xi32>
    %11 = arith.cmpi slt, %7, %10 : vector<2x128xi32>
    %12 = arith.andi %9, %11 : vector<2x128xi1>
    %13 = arith.negf %6 : vector<2x128xf32>
    %14 = math.exp %13 : vector<2x128xf32>
    %cst_5 = arith.constant 1.000000e+00 : f32
    %15 = vector.broadcast %cst_5 : f32 to vector<2x128xf32>
    %16 = arith.addf %15, %14 : vector<2x128xf32>
    %17 = arith.divf %15, %16 : vector<2x128xf32>
    %18 = arith.select %12, %17, %6 : vector<2x128xi1>, vector<2x128xf32>
    %c0_6 = arith.constant 0 : index
    %c0_7 = arith.constant 0 : index
    %19 = vector.load %arg3[%c0_6, %c0_7] : memref<2x128xf32, #tpu.memory_space<vmem>>, vector<2x128xf32>
    tpu.vector_store %arg3[%c0_6, %c0_7], %18 {strides = array<i32>} : memref<2x128xf32, #tpu.memory_space<vmem>>, vector<2x128xf32>,
    return
  }
}

</mosaic_0001>

<bundles_post_ra>
// kernel: _lambda_.1
= control target key start
LH: loop header
LB: loop body
LE: loop exit
PB: predicated region body
PF: predicated region fallthrough
CT: control target
= control target key end

     0   :  { %v198_v0 = vmov 0.0   ;;  %vm199_vm0 = vmmov 0   ;;  %v128_v19 = vlaneseq  ;;  %s253_s1 = inlined_call_operand.vmem [shape: bf16[128,128], index: 1, kind: input, shape index: {}]   ;;  %s254_s0 = inlined_call_operand.vmem [shape: f32[2,128], index: 0, kind: input, shape index: {}]   ;;  %s255_s2 = inlined_call_operand.vmem [shape: f32[1,128], index: 2, kind: input, shape index: {}]   ;;  %s256_s3 = inlined_call_operand.vmem [shape: f32[2,128], index: 3, kind: output, shape index: {}]  }
   0x1   :  { %164 = vmatprep.subr.bf16.mxu0 %v198_v0  ;;  %v186_v1 = vld [vmem:[%s253_s1] sm:$0xff]   ;;  %180 = vmatprep.mubr.msk.bf16.mxu0 %vm199_vm0, %v198_v0  ;;  %v187_v2 = vld [vmem:[%s253_s1 + $0x8] sm:$0xff]   ;;  %v188_v3 = vld [vmem:[%s253_s1 + $0x10] sm:$0xff]  }
   0x2   :  { %165 = vmatpush3.bf16.msra.mxu0 %v186_v1  ;;  %v189_v4 = vld [vmem:[%s253_s1 + $0x18] sm:$0xff]   ;;  %v190_v5 = vld [vmem:[%s253_s1 + $0x20] sm:$0xff]   ;;  %v191_v6 = vld [vmem:[%s253_s1 + $0x28] sm:$0xff]   ;;  %v129_v21 = vand.u32 127, %v128_v19 }
   0x3   :  { %166 = vmatprep.subr.bf16.mxu0 %v198_v0  ;;  %v192_v7 = vld [vmem:[%s253_s1 + $0x30] sm:$0xff]   ;;  %v193_v8 = vld [vmem:[%s253_s1 + $0x38] sm:$0xff]   ;;  %v15_v9 = vld [vmem:[%s254_s0] sm:$0x3] }
   0x4   :  { %v16_v10 = vpack.c.bf16 %v15_v9, %v15_v9  ;;  %v145_v11 = vld [vmem:[%s255_s2] ss:$0 sm:$0xff]  ;;  %vm130_vm1 = vcmp.ge.s32.totalorder %v129_v21, 18  ;;  %vm131_vm2 = vcmp.lt.s32.totalorder %v129_v21, 26 }
   0x5   :  { %vm132_vm3 = vmand %vm130_vm1, %vm131_vm2 }
   0x6   :  { %167 = vmatpush3.bf16.msra.mxu0 %v187_v2 }
   0x7   :  { %168 = vmatprep.subr.bf16.mxu0 %v198_v0 }
   0xa   :  { %169 = vmatpush3.bf16.msra.mxu0 %v188_v3 }
   0xb   :  { %170 = vmatprep.subr.bf16.mxu0 %v198_v0 }
   0xe   :  { %171 = vmatpush3.bf16.msra.mxu0 %v189_v4 }
   0xf   :  { %172 = vmatprep.subr.bf16.mxu0 %v198_v0 }
  0x12   :  { %173 = vmatpush3.bf16.msra.mxu0 %v190_v5 }
  0x13   :  { %174 = vmatprep.subr.bf16.mxu0 %v198_v0 }
  0x16   :  { %175 = vmatpush3.bf16.msra.mxu0 %v191_v6 }
  0x17   :  { %176 = vmatprep.subr.bf16.mxu0 %v198_v0 }
  0x1a   :  { %177 = vmatpush3.bf16.msra.mxu0 %v192_v7 }
  0x1b   :  { %178 = vmatprep.subr.bf16.mxu0 %v198_v0 }
  0x1e   :  { %179 = vmatpush3.bf16.msra.mxu0 %v193_v8 }
  0x21   :  { %181 = vmatmul.mubr.bf16.vlgmr.msra.gmra.mrb[0].mxu0 %v16_v10 }
  0xf4   :  { %v122_v12 = vpop.f32.mrb[0].mxu0 }
  0xf5   :  { %v123_v13 = vadd.f32 %v145_v11, %v122_v12  ;;  %v182_v14 = vpop.f32.mrb[1].mxu0 }
  0xf6   :  { %v125_v15 = vpop.f32.mrb[2].mxu0 }
  0xf7   :  { %v154_v16 = vmul.f32 -1.442695, %v123_v13  ;;  %v183_v17 = vpop.f32.mrb[3].mxu0 }
  0xf9   :  { %194 = vpow2.f32 %v154_v16 }
 0x103   :  { %v195_v18 = vpop.eup %194 }
 0x104   :  { %v136_v20 = vadd.f32 1.0, %v195_v18 }
 0x106   :  { %196 = vrcp.f32 %v136_v20 }
 0x110   :  { %v197_v22 = vpop.eup %196 }
 0x111   :  { %v139_v23 = vsel %vm132_vm3, %v197_v22, %v123_v13 }
 0x112   :  { %140 = vst [vmem:[%s256_s3] sm:$0x3] %v139_v23 }

</bundles_post_ra>
